<compile_context>
chip_gen: v7x
topology: tpu7x:2x2x1
jax: 0.10.0
libtpu: 0.0.40
codegen_flags: <defaults>
</compile_context>

<pallas_src>
import functools

import jax
import jax.numpy as jnp
from jax.experimental import pallas as pl
from jax.experimental.pallas import tpu as pltpu

# ----------------------------- configuration ------------------------------
C_IN = 3            # len(PIXEL_MEAN)
FEAT = 32           # backbone feature channels
MAX_NUM = 8         # cfg.MODEL.FLOWSETNET.MAX_ELEMENT_NUM
ELEM_DIM = 4        # box = (x1, y1, x2, y2)
SCORE_THRESH = 0.5  # cfg.MODEL.FLOWSETNET.SCORE_THRESH_TEST
MAX_HW_TILE = 8192  # lane-axis tile cap (fits comfortably in VMEM on v5e..v7x)

PIXEL_MEAN = jnp.array([103.53, 116.28, 123.675], dtype=jnp.float32)
PIXEL_STD = jnp.array([57.375, 57.12, 58.395], dtype=jnp.float32)


# ------------------------------- kernel -------------------------------------
def fused_backbone_pool_kernel(x_ref, w_ref, b_ref, pooled_ref, acc_ref, *,
                               inv_hw):
    """Fused: (normalization-folded) 1x1 conv + ReLU + global-average-pool.

    Grid: (B, HW // T_HW);  axis 0 "parallel" (images), axis 1 "arbitrary"
    (spatial tiles carrying the pooled accumulator).

    x_ref:      (C, T_HW)   one spatial tile of one image
    w_ref:      (FEAT, C)   conv weight with 1/std folded in
    b_ref:      (FEAT, 1)   conv bias with -w @ (mean/std) folded in
    pooled_ref: (FEAT, 1)   output block (resident across the HW-tile axis)
    acc_ref:    (FEAT, 1)   VMEM scratch: running sum of ReLU(conv) over HW
    """
    t = pl.program_id(1)

    @pl.when(t == 0)
    def _():
        acc_ref[...] = jnp.zeros_like(acc_ref)

    # (FEAT, C) @ (C, T_HW) -> (FEAT, T_HW); K=3 so this is HBM-bound, not MXU.
    f = jnp.dot(w_ref[...], x_ref[...], preferred_element_type=jnp.float32)
    f = jnp.maximum(f + b_ref[...], 0.0)
    acc_ref[...] += jnp.sum(f, axis=-1, keepdims=True)

    @pl.when(t == pl.num_programs(1) - 1)
    def _():
        pooled_ref[...] = acc_ref[...] * inv_hw


def _pick_hw_tile(hw):
    """Largest tile <= MAX_HW_TILE that is either the full HW or a multiple of
    128 dividing HW (keeps BlockSpec lane constraints satisfied)."""
    if hw <= MAX_HW_TILE:
        return hw
    t = MAX_HW_TILE  # multiple of 128
    while t >= 128:
        if hw % t == 0:
            return t
        t -= 128
    return hw  # no aligned divisor found; fall back to the whole image


# ------------------------------- wrapper ------------------------------------
def init_params(key):
    """Deterministic xavier_uniform weights, zero biases (mirrors __init__)."""
    k1, k2, k3 = jax.random.split(key, 3)

    def xavier(k, shape, fan_in, fan_out):
        a = (6.0 / (fan_in + fan_out)) ** 0.5
        return jax.random.uniform(k, shape, jnp.float32, -a, a)

    return {
        # 1x1 conv: weight (F, C, 1, 1) -> stored as (F, C)
        "w_bb": xavier(k1, (FEAT, C_IN), C_IN, FEAT),
        "b_bb": jnp.zeros((FEAT, 1), jnp.float32),
        # element head: Linear(F, MAX_NUM*4), stored transposed (F, MAX_NUM*4)
        "w_elem": xavier(k2, (FEAT, MAX_NUM * ELEM_DIM), FEAT, MAX_NUM * ELEM_DIM),
        "b_elem": jnp.zeros((1, MAX_NUM * ELEM_DIM), jnp.float32),
        # mask head: Linear(F, MAX_NUM), stored transposed (F, MAX_NUM)
        "w_mask": xavier(k3, (FEAT, MAX_NUM), FEAT, MAX_NUM),
        "b_mask": jnp.zeros((1, MAX_NUM), jnp.float32),
    }


@jax.jit
def flow_set_net_forward(x, params):
    """x: float32 [B, C_IN, H, W] (NCHW).  Returns inference outputs."""
    B, C, H, W = x.shape
    assert C == C_IN
    HW = H * W
    x_flat = x.reshape(B, C, HW)

    # Fold the normalizer (x - mean)/std into the 1x1 conv:
    #   w @ ((x - mean)/std) + b == (w/std) @ x + (b - w @ (mean/std))
    inv_std = (1.0 / PIXEL_STD).reshape(1, C_IN)
    w_eff = params["w_bb"] * inv_std                                     # (F, C)
    b_eff = params["b_bb"] - params["w_bb"] @ (PIXEL_MEAN / PIXEL_STD).reshape(C_IN, 1)

    t_hw = _pick_hw_tile(HW)
    n_t = pl.cdiv(HW, t_hw)

    kernel = functools.partial(fused_backbone_pool_kernel, inv_hw=1.0 / HW)

    # ---- fused kernel: conv + ReLU + global-avg-pool, no HBM intermediate ----
    pooled = pl.pallas_call(
        kernel,
        out_shape=jax.ShapeDtypeStruct((B, FEAT, 1), jnp.float32),
        grid=(B, n_t),
        in_specs=[
            pl.BlockSpec((None, C_IN, t_hw), lambda b, t: (b, 0, t)),
            pl.BlockSpec((FEAT, C_IN), lambda b, t: (0, 0)),
            pl.BlockSpec((FEAT, 1), lambda b, t: (0, 0)),
        ],
        out_specs=pl.BlockSpec((None, FEAT, 1), lambda b, t: (b, 0, 0)),
        scratch_shapes=[pltpu.VMEM((FEAT, 1), jnp.float32)],
        compiler_params=pltpu.CompilerParams(
            dimension_semantics=("parallel", "arbitrary")),
        cost_estimate=pl.CostEstimate(
            flops=2 * B * FEAT * C_IN * HW,
            transcendentals=0,
            bytes_accessed=(B * C_IN * HW + B * FEAT
                            + FEAT * C_IN + FEAT) * 4),
    )(x_flat, w_eff, b_eff)

    pooled = pooled[..., 0]                                              # (B, F)

    # ---- decoder heads + inference postprocess (plain XLA: ~2k FLOPs, tiny
    # <128-lane outputs; a Pallas kernel here would pay masked-store overhead) --
    elems = pooled @ params["w_elem"] + params["b_elem"]     # (B, MAX_NUM*4)
    logits = pooled @ params["w_mask"] + params["b_mask"]    # (B, MAX_NUM)
    out_elements = jax.nn.sigmoid(elems).reshape(B, MAX_NUM, ELEM_DIM)
    scores = jax.nn.sigmoid(logits)                          # BCELoss-style probs

    sheep = jnp.array([W, H, W, H], dtype=jnp.float32)       # [width,height,...]
    pred_boxes = out_elements * sheep
    keep = (scores > SCORE_THRESH).astype(jnp.int32)
    # Reference does torch.zeros_like(scores); classes are semantically integer.
    pred_classes = jnp.zeros((B, MAX_NUM), jnp.int32)
    # TODO(synk): `out_elements[keep]` in the reference compacts to a dynamic
    # number of instances; under jit we return dense boxes + keep mask instead.
    return pred_boxes, scores, keep, pred_classes


# --------------------------------- main -------------------------------------
if __name__ == "__main__":
    key = jax.random.PRNGKey(0)
    k_img, k_par = jax.random.split(key)

    B, H, W = 2, 16, 16
    # synthetic uint8-style image values in [0, 255), NCHW
    x = jax.random.uniform(k_img, (B, C_IN, H, W), jnp.float32, 0.0, 255.0)
    params = init_params(k_par)

    pred_boxes, scores, keep, pred_classes = flow_set_net_forward(x, params)
    jax.block_until_ready((pred_boxes, scores, keep, pred_classes))

    assert pred_boxes.shape == (B, MAX_NUM, ELEM_DIM)
    assert scores.shape == (B, MAX_NUM)
    assert keep.shape == (B, MAX_NUM)
    assert pred_classes.shape == (B, MAX_NUM)
    assert bool(jnp.all(jnp.isfinite(pred_boxes)))
    assert bool(jnp.all((scores >= 0.0) & (scores <= 1.0)))
    print("KERNEL_OK")
</pallas_src>

<mosaic_0001>
module attributes {stable_mosaic.version = 11 : i64} {
  func.func @fused_backbone_pool_kernel(%arg0: i32, %arg1: i32, %arg2: memref<1x3x256xf32, #tpu.memory_space<vmem>>, %arg3: memref<32x3xf32, #tpu.memory_space<vmem>>, %arg4: memref<32x1xf32, #tpu.memory_space<vmem>>, %arg5: memref<1x32x1xf32, #tpu.memory_space<vmem>>, %arg6: memref<32x1xf32, #tpu.memory_space<vmem>>) attributes {dimension_semantics = [#tpu.dimension_semantics<parallel>, #tpu.dimension_semantics<arbitrary>], iteration_bounds = array<i64: 2, 1>, scalar_prefetch = 0 : i64, scratch_operands = 1 : i64, tpu.core_type = #tpu.core_type<tc>, window_params = [{transform_indices = @transform_0, window_bounds = array<i64: 1, 3, 256>}, {pipeline_mode = #tpu.pipeline_mode<synchronous>, transform_indices = @transform_1, window_bounds = array<i64: 32, 3>}, {pipeline_mode = #tpu.pipeline_mode<synchronous>, transform_indices = @transform_2, window_bounds = array<i64: 32, 1>}, {transform_indices = @transform_3, window_bounds = array<i64: 1, 32, 1>}]} {
    %c0_i32 = arith.constant 0 : i32
    %0 = arith.cmpi eq, %arg1, %c0_i32 : i32
    %1 = arith.extui %0 : i1 to i32
    %c0_i32_0 = arith.constant 0 : i32
    %2 = arith.cmpi ne, %1, %c0_i32_0 : i32
    scf.if %2 {
      %cst_15 = arith.constant 0.000000e+00 : f32
      %20 = vector.broadcast %cst_15 : f32 to vector<32x1xf32>
      %c0_16 = arith.constant 0 : index
      %c0_17 = arith.constant 0 : index
      %21 = vector.load %arg6[%c0_16, %c0_17] : memref<32x1xf32, #tpu.memory_space<vmem>>, vector<32x1xf32>
      tpu.vector_store %arg6[%c0_16, %c0_17], %20 {strides = array<i32>} : memref<32x1xf32, #tpu.memory_space<vmem>>, vector<32x1xf32>,
    } else {
    }
    %c0 = arith.constant 0 : index
    %c0_1 = arith.constant 0 : index
    %3 = vector.load %arg3[%c0, %c0_1] : memref<32x3xf32, #tpu.memory_space<vmem>>, vector<32x3xf32>
    %c0_2 = arith.constant 0 : index
    %c0_3 = arith.constant 0 : index
    %c0_4 = arith.constant 0 : index
    %4 = vector.load %arg2[%c0_2, %c0_3, %c0_4] : memref<1x3x256xf32, #tpu.memory_space<vmem>>, vector<1x3x256xf32>
    %5 = vector.shape_cast %4 : vector<1x3x256xf32> to vector<3x256xf32>
    %cst = arith.constant dense<0.000000e+00> : vector<32x256xf32>
    %6 = tpu.matmul %3, %5, %cst {dimension_numbers = #tpu.dot_dimension_numbers<[1], [0], [0], [1], [0, 0, 1, 1], [], []>} : vector<32x3xf32>, vector<3x256xf32>, vector<32x256xf32> -> vector<32x256xf32>
    %c0_5 = arith.constant 0 : index
    %c0_6 = arith.constant 0 : index
    %7 = vector.load %arg4[%c0_5, %c0_6] : memref<32x1xf32, #tpu.memory_space<vmem>>, vector<32x1xf32>
    %8 = vector.broadcast %7 : vector<32x1xf32> to vector<32x256xf32>
    %9 = arith.addf %6, %8 : vector<32x256xf32>
    %cst_7 = arith.constant 0.000000e+00 : f32
    %10 = vector.broadcast %cst_7 : f32 to vector<32x256xf32>
    %11 = arith.maximumf %9, %10 : vector<32x256xf32>
    %c0_8 = arith.constant 0 : index
    %c0_9 = arith.constant 0 : index
    %12 = vector.load %arg6[%c0_8, %c0_9] : memref<32x1xf32, #tpu.memory_space<vmem>>, vector<32x1xf32>
    %cst_10 = arith.constant dense<0.000000e+00> : vector<32xf32>
    %13 = vector.multi_reduction <add>, %11, %cst_10 [1] : vector<32x256xf32> to vector<32xf32>
    %14 = vector.shape_cast %13 : vector<32xf32> to vector<32x1xf32>
    %15 = arith.addf %12, %14 : vector<32x1xf32>
    %c0_11 = arith.constant 0 : index
    %c0_12 = arith.constant 0 : index
    %16 = vector.load %arg6[%c0_11, %c0_12] : memref<32x1xf32, #tpu.memory_space<vmem>>, vector<32x1xf32>
    tpu.vector_store %arg6[%c0_11, %c0_12], %15 {strides = array<i32>} : memref<32x1xf32, #tpu.memory_space<vmem>>, vector<32x1xf32>,
    %c0_i32_13 = arith.constant 0 : i32
    %17 = arith.cmpi eq, %arg1, %c0_i32_13 : i32
    %18 = arith.extui %17 : i1 to i32
    %c0_i32_14 = arith.constant 0 : i32
    %19 = arith.cmpi ne, %18, %c0_i32_14 : i32
    scf.if %19 {
      %c0_15 = arith.constant 0 : index
      %c0_16 = arith.constant 0 : index
      %20 = vector.load %arg6[%c0_15, %c0_16] : memref<32x1xf32, #tpu.memory_space<vmem>>, vector<32x1xf32>
      %cst_17 = arith.constant 3.906250e-03 : f32
      %21 = vector.broadcast %cst_17 : f32 to vector<32x1xf32>
      %22 = arith.mulf %20, %21 : vector<32x1xf32>
      %c0_18 = arith.constant 0 : index
      %c0_19 = arith.constant 0 : index
      %c0_20 = arith.constant 0 : index
      %23 = vector.load %arg5[%c0_18, %c0_19, %c0_20] : memref<1x32x1xf32, #tpu.memory_space<vmem>>, vector<1x32x1xf32>
      %24 = vector.shape_cast %23 : vector<1x32x1xf32> to vector<32x1xf32>
      %25 = vector.shape_cast %22 : vector<32x1xf32> to vector<1x32x1xf32>
      tpu.vector_store %arg5[%c0_18, %c0_19, %c0_20], %25 {strides = array<i32>} : memref<1x32x1xf32, #tpu.memory_space<vmem>>, vector<1x32x1xf32>,
    } else {
    }
    return
  }
  func.func @transform_0(%arg0: i32, %arg1: i32) -> (i32, i32, i32) {
    %c0_i32 = arith.constant 0 : i32
    %c0_i32_0 = arith.constant 0 : i32
    return %arg0, %c0_i32, %arg1 : i32, i32, i32
  }
  func.func @transform_1(%arg0: i32, %arg1: i32) -> (i32, i32) {
    %c0_i32 = arith.constant 0 : i32
    %c0_i32_0 = arith.constant 0 : i32
    %c0_i32_1 = arith.constant 0 : i32
    return %c0_i32, %c0_i32_0 : i32, i32
  }
  func.func @transform_2(%arg0: i32, %arg1: i32) -> (i32, i32) {
    %c0_i32 = arith.constant 0 : i32
    %c0_i32_0 = arith.constant 0 : i32
    %c0_i32_1 = arith.constant 0 : i32
    return %c0_i32, %c0_i32_0 : i32, i32
  }
  func.func @transform_3(%arg0: i32, %arg1: i32) -> (i32, i32, i32) {
    %c0_i32 = arith.constant 0 : i32
    %c0_i32_0 = arith.constant 0 : i32
    %c0_i32_1 = arith.constant 0 : i32
    return %arg0, %c0_i32, %c0_i32_0 : i32, i32, i32
  }
}

</mosaic_0001>

<bundles_post_ra>
// kernel: flow_set_net_forward.1
= control target key start
LH: loop header
LB: loop body
LE: loop exit
PB: predicated region body
PF: predicated region fallthrough
CT: control target
= control target key end

     0   :  { %s559_s12 = smov 0   ;;  %s561_s13 = smov 0   ;;  %s632_s0 = inlined_call_operand.vmem [shape: f32[2,3,256], index: 0, kind: input, shape index: {}]   ;;  %s633_s1 = inlined_call_operand.vmem [shape: f32[32,3], index: 1, kind: input, shape index: {}]   ;;  %s634_s2 = inlined_call_operand.vmem [shape: f32[32,1], index: 2, kind: input, shape index: {}]   ;;  %s635_s3 = inlined_call_operand.vmem [shape: f32[2,32,1], index: 3, kind: output, shape index: {}]  }
   0x1   :  { %s563_s14 = smov 0  }
   0x2 LB: > { %s25_s15 = sadd.s32 1, %s531_s13  ;;  %p467_p0 = scmp.ge.s32.totalorder %s535_s14, 1  ;;  %s535_s14 = sphi %s563_s14, %s13_s14   ;;  %s531_s13 = sphi %s561_s13, %s637_s13   ;;  %s527_s12 = sphi %s559_s12, %s636_s12  }
   0x3   : > { %p27_p1 = scmp.ge.s32.totalorder %s25_s15, 2  ;;  %p156_p2 = scmp.lt.s32.totalorder %s535_s14, 3 }
   0x5   : > { %s639_s15 = smov (%p27_p1, %s25_s15), 0  ;;  %p157_p3 = pnand %p467_p0, %p156_p2 }
   0x6   : > { %p185_p4 = scmp.lt.s32.totalorder (!%p157_p3), %s527_s12, 1  ;;  %v537_v0 = vmov (!%p157_p3), 0.0   ;;  %v213_v1 = vld [vmem:[%s634_s2] sm:$0xff] (!%p157_p3)  ;;  %v538_v2 = vmov (!%p157_p3), 0   ;;  %v215_v3 = vld [vmem:[%s634_s2 + $0x10] sm:$0xff] (!%p157_p3)  ;;  %v214_v4 = vld [vmem:[%s634_s2 + $0x8] sm:$0xff] (!%p157_p3) }
   0x7   : > { %160 = sbr.rel (%p157_p3) target bundleno = 404 (0x194), region = 32  ;;  %321 = vmatprep.mubr.f32.mxu0 (!%p157_p3), %v537_v0  ;;  %333 = vmatprep.mubr.f32.mxu1 (!%p157_p3), %v537_v0  ;;  %v216_v5 = vld [vmem:[%s634_s2 + $0x18] sm:$0xff] (!%p157_p3)  ;;  %vm252_vm0 = vcmask (!%p157_p3), 1042432   ;;  %v208_v8 = vld [vmem:[%s633_s1] sm:$0xff] (!%p157_p3)  ;;  %vm239_vm1 = vcmask (!%p157_p3), 23552   ;;  %v210_v9 = vld [vmem:[%s633_s1 + $0x10] sm:$0xff] (!%p157_p3) }
   0x8   : > { %510 = vset.pattern.permute.xlu0 (!%p157_p3), %v538_v2  ;;  %511 = vset.pattern.permute.xlu1 (!%p157_p3), %v538_v2  ;;  %v209_v10 = vld [vmem:[%s633_s1 + $0x8] sm:$0xff] (!%p157_p3)  ;;  %v211_v11 = vld [vmem:[%s633_s1 + $0x18] sm:$0xff] (!%p157_p3)  ;;  %vm203_vm2 = vcmask (!%p157_p3), 7168  }
   0x9   : > { %219 = vperm.xlu0 (!%p157_p3), %510, %v213_v1   ;;  %229 = vperm.xlu1 (!%p157_p3), %511, %v215_v3   ;;  %204 = vst.msk [vmem:[#allocation2] sm:$0xff] (!%p157_p3), %vm203_vm2, %v537_v0  ;;  %205 = vst.msk [vmem:[#allocation2 + $0x8] sm:$0xff] (!%p157_p3), %vm203_vm2, %v537_v0 }
   0xa   : > { %206 = vst.msk [vmem:[#allocation2 + $0x10] sm:$0xff] (!%p157_p3), %vm203_vm2, %v537_v0  ;;  %207 = vst.msk [vmem:[#allocation2 + $0x18] sm:$0xff] (!%p157_p3), %vm203_vm2, %v537_v0 }
   0xd   : > { %224 = vperm.xlu0 (!%p157_p3), %510, %v214_v4   ;;  %234 = vperm.xlu1 (!%p157_p3), %511, %v216_v5  }
   0xe   : > { %s641_s12 = smov (!%p185_p4, %s527_s12), 1 }
   0xf   : > { %s480_s20 = sshll.u32 %s641_s12, 3  ;;  %s481_s9 = sshll.u32 %s641_s12, 5 }
  0x10   : > { %s192_s27 = scalar_lea.vmem %s632_s0, %s480_s20  ;;  %v354_v44 = vld [vmem:[#allocation2] sm:$0xff]  ;;  %v355_v47 = vld [vmem:[#allocation2 + $0x8] sm:$0xff]  ;;  %s198_s16 = scalar_lea.vmem %s635_s3, %s481_s9 }
  0x11   : > { %v212_v6 = vld [vmem:[%s192_s27] sm:$0x77]  ;;  %v356_v48 = vld [vmem:[#allocation2 + $0x10] sm:$0xff]  ;;  %v357_v53 = vld [vmem:[#allocation2 + $0x18] sm:$0xff] }
  0x12   : > { %v238_v7 = vcombine.high %v212_v6, %v212_v6 }
  0x14   : > { %472 = vmatprep.subr.msk.mxu0 %vm252_vm0, %v238_v7  ;;  %482 = vmatprep.subr.msk.mxu1 %vm252_vm0, %v238_v7 }
  0x15   : > { %473 = vmatpush1.msk.msra.mxu0 %vm252_vm0, %v212_v6  ;;  %483 = vmatpush1.msk.msra.mxu1 %vm252_vm0, %v212_v6 }
  0x16   : > { %474 = vmatmul.mubr.msk.f32.vlgmr.msra.gmra.mrb[0].mxu0 %vm239_vm1, %v208_v8  ;;  %476 = vmatmul.mubr.msk.f32.vlgmr.msra.gmra.mrb[0].mxu1 %vm239_vm1, %v210_v9 }
  0x17   : > { %327 = vmatprep.mubr.f32.mxu0 %v537_v0  ;;  %339 = vmatprep.mubr.f32.mxu1 %v537_v0 }
  0x1a   : > { %475 = vmatmul.mubr.msk.f32.gmra.mrb[2].mxu0 %vm239_vm1, %v209_v10  ;;  %477 = vmatmul.mubr.msk.f32.gmra.mrb[2].mxu1 %vm239_vm1, %v211_v11 }
  0x88   : > { %v230_v12 = vpop.permute.xlu1 %229  ;;  %v220_v13 = vpop.permute.xlu0 %219 }
  0x8c   : > { %v235_v22 = vpop.permute.xlu1 %234  ;;  %v225_v24 = vpop.permute.xlu0 %224 }
  0xe9   : > { %v323_v14 = vpop.f32.mrb[0].mxu0  ;;  %v335_v15 = vpop.f32.mrb[0].mxu1 }
  0xea   : > { %v324_v16 = vadd.f32 %v323_v14, %v220_v13  ;;  %v325_v17 = vpop.f32.mrb[1].mxu0  ;;  %v336_v18 = vadd.f32 %v335_v15, %v230_v12  ;;  %v337_v19 = vpop.f32.mrb[1].mxu1 }
  0xeb   : > { %v326_v20 = vadd.f32 %v325_v17, %v220_v13  ;;  %v338_v21 = vadd.f32 %v337_v19, %v230_v12 }
  0xec   : > { %v346_v23 = vmax.f32 %v324_v16, 0.0  ;;  %v350_v25 = vmax.f32 %v336_v18, 0.0 }
  0xed   : > { %v347_v26 = vmax.f32 %v326_v20, 0.0  ;;  %v351_v27 = vmax.f32 %v338_v21, 0.0  ;;  %v329_v28 = vpop.f32.mrb[2].mxu0  ;;  %v341_v29 = vpop.f32.mrb[2].mxu1 }
  0xee   : > { %v330_v30 = vadd.f32 %v329_v28, %v225_v24  ;;  %v342_v31 = vadd.f32 %v341_v29, %v235_v22  ;;  %v331_v32 = vpop.f32.mrb[3].mxu0  ;;  %v343_v33 = vpop.f32.mrb[3].mxu1 }
  0xef   : > { %v332_v34 = vadd.f32 %v331_v32, %v225_v24  ;;  %v344_v35 = vadd.f32 %v343_v33, %v235_v22  ;;  %v358_v36 = vadd.f32 %v347_v26, %v346_v23  ;;  %v364_v37 = vadd.f32 %v351_v27, %v350_v25 }
  0xf0   : > { %v348_v38 = vmax.f32 %v330_v30, 0.0  ;;  %v352_v39 = vmax.f32 %v342_v31, 0.0 }
  0xf1   : > { %v349_v40 = vmax.f32 %v332_v34, 0.0  ;;  %v353_v41 = vmax.f32 %v344_v35, 0.0  ;;  %359 = vadd.xlane.f32.xlu0 %v358_v36 }
  0xf3   : > { %v361_v42 = vadd.f32 %v349_v40, %v348_v38  ;;  %v367_v43 = vadd.f32 %v353_v41, %v352_v39 }
  0xf5   : > { %362 = vadd.xlane.f32.xlu1 %v361_v42  ;;  %365 = vadd.xlane.f32.xlu0 %v364_v37 }
  0xf9   : > { %368 = vadd.xlane.f32.xlu0 %v367_v43 }
 0x17e   : > { %v360_v45 = vpop.xlane.xlu0 %359 }
 0x17f   : > { %v370_v46 = vadd.f32 %v360_v45, %v354_v44 }
 0x181   : > { %375 = vst.msk [vmem:[#allocation2] sm:$0xff] %vm203_vm2, %v370_v46 }
 0x182   : > { %v363_v49 = vpop.xlane.xlu1 %362  ;;  %v366_v50 = vpop.xlane.xlu0 %365 }
 0x183   : > { %v371_v51 = vadd.f32 %v363_v49, %v355_v47  ;;  %v372_v52 = vadd.f32 %v366_v50, %v356_v48 }
 0x185   : > { %376 = vst.msk [vmem:[#allocation2 + $0x8] sm:$0xff] %vm203_vm2, %v371_v51  ;;  %377 = vst.msk [vmem:[#allocation2 + $0x10] sm:$0xff] %vm203_vm2, %v372_v52 }
 0x186   : > { %v369_v54 = vpop.xlane.xlu0 %368 }
 0x187   : > { %v373_v55 = vadd.f32 %v369_v54, %v357_v53 }
 0x188   : > { %v382_v56 = vld [vmem:[#allocation2] sm:$0xff] }
 0x189   : > { %v386_v57 = vmul.f32 0.00390625, %v382_v56  ;;  %378 = vst.msk [vmem:[#allocation2 + $0x18] sm:$0xff] %vm203_vm2, %v373_v55 }
 0x18b   : > { %390 = vst.msk [vmem:[%s198_s16] sm:$0xff] %vm203_vm2, %v386_v57 }
 0x18c   : > { %v383_v58 = vld [vmem:[#allocation2 + $0x8] sm:$0xff]  ;;  %v384_v59 = vld [vmem:[#allocation2 + $0x10] sm:$0xff] }
 0x18d   : > { %v387_v60 = vmul.f32 0.00390625, %v383_v58  ;;  %v388_v61 = vmul.f32 0.00390625, %v384_v59 }
 0x18f   : > { %391 = vst.msk [vmem:[%s198_s16 + $0x8] sm:$0xff] %vm203_vm2, %v387_v60  ;;  %392 = vst.msk [vmem:[%s198_s16 + $0x10] sm:$0xff] %vm203_vm2, %v388_v61 }
 0x190   : > { %v385_v62 = vld [vmem:[#allocation2 + $0x18] sm:$0xff] }
 0x191   : > { %v389_v63 = vmul.f32 0.00390625, %v385_v62 }
 0x193   : > { %393 = vst.msk [vmem:[%s198_s16 + $0x18] sm:$0xff] %vm203_vm2, %v389_v63 }
 0x194 PF: > { %s13_s14 = sadd.s32 1, %s535_s14   ;;  %s636_s12 = smov %s531_s13 }
 0x195   : > { %p10_p5 = scmp.ge.s32.totalorder %s13_s14, 4   ;;  %s637_s13 = smov %s639_s15 }
 0x197   :  { %12 = sbr.rel (!%p10_p5) target bundleno = 2 (0x2), region = 70 }

</bundles_post_ra>
